<compile_context>
chip_gen: v5e
topology: v5e:2x2
jax: 0.10.0
libtpu: 0.0.40
codegen_flags: <defaults>
</compile_context>

<pallas_src>
import functools

import jax
import jax.numpy as jnp
from jax.experimental import pallas as pl
from jax.experimental.pallas import tpu as pltpu

LANE = 128            # slab width (minimum unmasked lane width)
SUBLANE = 8
MAX_TILE_ROWS = 1024  # 1024*128*4B = 512 KiB per f32 block; safe for v7x VMEM


def _cdiv(a, b):
    return -(-a // b)


def _round_up(a, b):
    return _cdiv(a, b) * b


def _loss_f32(x, t, gamma_small, gamma_large, threshold, beta):
    """Element-wise SmoothFocalL1 loss in f32 (tanh-form sigmoid, folded pow)."""
    l1 = jnp.abs(x - t)
    # sigmoid(z) == 0.5 * (1 + tanh(z/2)): one EUP push instead of exp + recip.
    sig = 0.5 * (1.0 + jnp.tanh((0.5 * beta) * (l1 - threshold)))
    gamma = sig * (gamma_large - gamma_small) + gamma_small
    # l1 * l1**gamma == l1**(gamma + 1); guard l1 == 0 so zero-padding is
    # exactly loss-neutral (matches torch: 0 * 0**gamma == 0).
    return jnp.where(l1 > 0.0, jnp.power(l1, gamma + 1.0), 0.0)


def _elem_kernel(x_ref, t_ref, o_ref, *, gamma_small, gamma_large, threshold,
                 beta):
    x = x_ref[...].astype(jnp.float32)
    t = t_ref[...].astype(jnp.float32)
    o_ref[...] = _loss_f32(x, t, gamma_small, gamma_large, threshold,
                           beta).astype(o_ref.dtype)


def _reduce_kernel(x_ref, t_ref, o_ref, acc_ref, *, gamma_small, gamma_large,
                   threshold, beta):
    i = pl.program_id(1)

    @pl.when(i == 0)
    def _():
        acc_ref[...] = jnp.zeros_like(acc_ref)

    x = x_ref[...].astype(jnp.float32)
    t = t_ref[...].astype(jnp.float32)
    loss = _loss_f32(x, t, gamma_small, gamma_large, threshold, beta)
    # Vreg-shaped accumulation: (tile_rows,128) -> (tile_rows//8, 8, 128) and
    # reduce over the leading (major) axis -> pure vector adds into an (8,128)
    # accumulator; no XLU reduction and no loop-carried scalar dependency.
    tile_rows = loss.shape[0]
    acc_ref[...] += jnp.sum(
        loss.reshape(tile_rows // SUBLANE, SUBLANE, LANE), axis=0)

    @pl.when(i == pl.num_programs(1) - 1)
    def _():
        o_ref[...] = acc_ref[...]


def _choose_tiling(rows, nsplit, max_tile=MAX_TILE_ROWS):
    """Pick (tile_rows, steps, rows_pad) with rows_pad = nsplit*steps*tile_rows
    >= rows, tile_rows a multiple of 8 and <= max_tile, padding overhead ~<=1%."""
    steps = max(1, _cdiv(rows, nsplit * max_tile))
    tile = _round_up(_cdiv(rows, nsplit * steps), SUBLANE)
    tile = max(SUBLANE, min(tile, max_tile))
    rows_pad = nsplit * steps * tile
    return tile, steps, rows_pad


def _to_slab(flat, rows_pad):
    n = flat.shape[0]
    pad = rows_pad * LANE - n
    if pad:
        flat = jnp.pad(flat, (0, pad))   # single copy, only when padding needed
    return flat.reshape(rows_pad, LANE)


def smooth_focal_l1_loss(inp, tgt, *, gamma_small=0.5, gamma_large=2.0,
                         threshold=1.0, beta=0.5, reduction='mean'):
    assert inp.shape == tgt.shape
    orig_shape = inp.shape
    orig_dtype = inp.dtype
    n = inp.size
    rows = max(1, _cdiv(n, LANE))

    params = dict(gamma_small=float(gamma_small),
                  gamma_large=float(gamma_large),
                  threshold=float(threshold), beta=float(beta))

    xf = jnp.reshape(inp, (-1,))   # keep original dtype; cast to f32 in-kernel
    tf = jnp.reshape(tgt, (-1,))

    if reduction == 'none':
        tile, steps, rows_pad = _choose_tiling(rows, nsplit=1)
        x2 = _to_slab(xf, rows_pad)
        t2 = _to_slab(tf, rows_pad)
        imap = lambda i: (i, 0)
        out = pl.pallas_call(
            functools.partial(_elem_kernel, **params),
            out_shape=jax.ShapeDtypeStruct((rows_pad, LANE), orig_dtype),
            grid_spec=pltpu.PrefetchScalarGridSpec(
                num_scalar_prefetch=0,
                grid=(steps,),
                in_specs=[pl.BlockSpec((tile, LANE), imap),
                          pl.BlockSpec((tile, LANE), imap)],
                out_specs=pl.BlockSpec((tile, LANE), imap),
            ),
            compiler_params=pltpu.CompilerParams(
                dimension_semantics=("parallel",)),
        )(x2, t2)
        return out.reshape(-1)[:n].reshape(orig_shape)

    if reduction not in ('mean', 'sum'):
        raise NotImplementedError(reduction)

    NSPLIT = 2   # leading parallel axis -> both TensorCores used on v7x
    tile, steps, rows_pad = _choose_tiling(rows, nsplit=NSPLIT)
    x2 = _to_slab(xf, rows_pad)
    t2 = _to_slab(tf, rows_pad)
    in_map = lambda c, i: (c * steps + i, 0)

    partials = pl.pallas_call(
        functools.partial(_reduce_kernel, **params),
        out_shape=jax.ShapeDtypeStruct((NSPLIT, SUBLANE, LANE), jnp.float32),
        grid_spec=pltpu.PrefetchScalarGridSpec(
            num_scalar_prefetch=0,
            grid=(NSPLIT, steps),
            in_specs=[pl.BlockSpec((tile, LANE), in_map),
                      pl.BlockSpec((tile, LANE), in_map)],
            out_specs=pl.BlockSpec((None, SUBLANE, LANE),
                                   lambda c, i: (c, 0, 0)),
            scratch_shapes=[pltpu.VMEM((SUBLANE, LANE), jnp.float32)],
        ),
        compiler_params=pltpu.CompilerParams(
            dimension_semantics=("parallel", "arbitrary")),
    )(x2, t2)

    total = jnp.sum(partials)   # tiny (2,8,128) final cross-lane reduce in JAX
    if reduction == 'sum':
        return total.astype(orig_dtype)
    return (total / jnp.float32(n)).astype(orig_dtype)


def _reference(inp, tgt, gamma_small=0.5, gamma_large=2.0, threshold=1.0,
               beta=0.5, reduction='mean'):
    # Plain-JAX port of the original PyTorch formulation (exp-form sigmoid,
    # un-folded power) used as the correctness oracle.
    x = inp.astype(jnp.float32)
    t = tgt.astype(jnp.float32)
    l1 = jnp.abs(x - t)
    sigmoid = 1.0 / (1.0 + jnp.exp(-beta * (l1 - threshold)))
    gamma = sigmoid * (gamma_large - gamma_small) + gamma_small
    loss = l1 * jnp.power(l1, gamma)
    if reduction == 'none':
        return loss
    if reduction == 'sum':
        return jnp.sum(loss)
    return jnp.mean(loss)


if __name__ == "__main__":
    key = jax.random.PRNGKey(0)
    k1, k2, k3, k4 = jax.random.split(key, 4)

    # small shapes consistent with a typical regression/detection head
    x = jax.random.normal(k1, (2, 4, 16, 16), dtype=jnp.float32)
    t = jax.random.normal(k2, (2, 4, 16, 16), dtype=jnp.float32)

    out_mean = smooth_focal_l1_loss(x, t, reduction='mean')
    out_sum = smooth_focal_l1_loss(x, t, reduction='sum')
    out_none = smooth_focal_l1_loss(x, t, reduction='none')
    jax.block_until_ready((out_mean, out_sum, out_none))

    assert jnp.allclose(out_mean, _reference(x, t, reduction='mean'),
                        rtol=1e-4, atol=1e-5)
    assert jnp.allclose(out_sum, _reference(x, t, reduction='sum'),
                        rtol=1e-4, atol=1e-4)
    assert jnp.allclose(out_none, _reference(x, t, reduction='none'),
                        rtol=1e-5, atol=1e-5)
    assert out_none.shape == x.shape

    # ragged shape: exercises zero-padding, the 2-level reduce grid and un-pad.
    x2 = jax.random.normal(k3, (3, 5, 37, 41), dtype=jnp.float32)
    t2 = jax.random.normal(k4, (3, 5, 37, 41), dtype=jnp.float32)
    out2_mean = smooth_focal_l1_loss(x2, t2, reduction='mean')
    out2_none = smooth_focal_l1_loss(x2, t2, reduction='none')
    jax.block_until_ready((out2_mean, out2_none))
    assert jnp.allclose(out2_mean, _reference(x2, t2, reduction='mean'),
                        rtol=1e-4, atol=1e-5)
    assert jnp.allclose(out2_none, _reference(x2, t2, reduction='none'),
                        rtol=1e-5, atol=1e-5)
    assert out2_none.shape == x2.shape

    print("KERNEL_OK")
</pallas_src>

<mosaic_0001>
module attributes {stable_mosaic.version = 11 : i64} {
  func.func @_reduce_kernel(%arg0: i32, %arg1: i32, %arg2: memref<8x128xf32, #tpu.memory_space<vmem>>, %arg3: memref<8x128xf32, #tpu.memory_space<vmem>>, %arg4: memref<1x8x128xf32, #tpu.memory_space<vmem>>, %arg5: memref<8x128xf32, #tpu.memory_space<vmem>>) attributes {dimension_semantics = [#tpu.dimension_semantics<parallel>, #tpu.dimension_semantics<arbitrary>], iteration_bounds = array<i64: 2, 1>, scalar_prefetch = 0 : i64, scratch_operands = 1 : i64, tpu.core_type = #tpu.core_type<tc>, window_params = [{transform_indices = @transform_0, window_bounds = array<i64: 8, 128>}, {transform_indices = @transform_1, window_bounds = array<i64: 8, 128>}, {transform_indices = @transform_2, window_bounds = array<i64: 1, 8, 128>}]} {
    %c0_i32 = arith.constant 0 : i32
    %0 = arith.cmpi eq, %arg1, %c0_i32 : i32
    %1 = arith.extui %0 : i1 to i32
    %c0_i32_0 = arith.constant 0 : i32
    %2 = arith.cmpi ne, %1, %c0_i32_0 : i32
    scf.if %2 {
      %cst_19 = arith.constant 0.000000e+00 : f32
      %35 = vector.broadcast %cst_19 : f32 to vector<8x128xf32>
      %c0_20 = arith.constant 0 : index
      %c0_21 = arith.constant 0 : index
      %36 = vector.load %arg5[%c0_20, %c0_21] : memref<8x128xf32, #tpu.memory_space<vmem>>, vector<8x128xf32>
      tpu.vector_store %arg5[%c0_20, %c0_21], %35 {strides = array<i32>} : memref<8x128xf32, #tpu.memory_space<vmem>>, vector<8x128xf32>,
    } else {
    }
    %c0 = arith.constant 0 : index
    %c0_1 = arith.constant 0 : index
    %3 = vector.load %arg2[%c0, %c0_1] : memref<8x128xf32, #tpu.memory_space<vmem>>, vector<8x128xf32>
    %c0_2 = arith.constant 0 : index
    %c0_3 = arith.constant 0 : index
    %4 = vector.load %arg3[%c0_2, %c0_3] : memref<8x128xf32, #tpu.memory_space<vmem>>, vector<8x128xf32>
    %5 = arith.subf %3, %4 : vector<8x128xf32>
    %6 = math.absf %5 : vector<8x128xf32>
    %cst = arith.constant 1.000000e+00 : f32
    %7 = vector.broadcast %cst : f32 to vector<8x128xf32>
    %8 = arith.subf %6, %7 : vector<8x128xf32>
    %cst_4 = arith.constant 2.500000e-01 : f32
    %9 = vector.broadcast %cst_4 : f32 to vector<8x128xf32>
    %10 = arith.mulf %9, %8 : vector<8x128xf32>
    %11 = math.tanh %10 : vector<8x128xf32>
    %cst_5 = arith.constant 1.000000e+00 : f32
    %12 = vector.broadcast %cst_5 : f32 to vector<8x128xf32>
    %13 = arith.addf %12, %11 : vector<8x128xf32>
    %cst_6 = arith.constant 5.000000e-01 : f32
    %14 = vector.broadcast %cst_6 : f32 to vector<8x128xf32>
    %15 = arith.mulf %14, %13 : vector<8x128xf32>
    %cst_7 = arith.constant 1.500000e+00 : f32
    %16 = vector.broadcast %cst_7 : f32 to vector<8x128xf32>
    %17 = arith.mulf %15, %16 : vector<8x128xf32>
    %cst_8 = arith.constant 5.000000e-01 : f32
    %18 = vector.broadcast %cst_8 : f32 to vector<8x128xf32>
    %19 = arith.addf %17, %18 : vector<8x128xf32>
    %cst_9 = arith.constant 0.000000e+00 : f32
    %20 = vector.broadcast %cst_9 : f32 to vector<8x128xf32>
    %21 = arith.cmpf ogt, %6, %20 : vector<8x128xf32>
    %cst_10 = arith.constant 1.000000e+00 : f32
    %22 = vector.broadcast %cst_10 : f32 to vector<8x128xf32>
    %23 = arith.addf %19, %22 : vector<8x128xf32>
    %24 = math.powf %6, %23 : vector<8x128xf32>
    %cst_11 = arith.constant 0.000000e+00 : f32
    %25 = vector.broadcast %cst_11 : f32 to vector<8x128xf32>
    %26 = arith.select %21, %24, %25 : vector<8x128xi1>, vector<8x128xf32>
    %c0_12 = arith.constant 0 : index
    %c0_13 = arith.constant 0 : index
    %27 = vector.load %arg5[%c0_12, %c0_13] : memref<8x128xf32, #tpu.memory_space<vmem>>, vector<8x128xf32>
    %28 = vector.shape_cast %26 : vector<8x128xf32> to vector<1x8x128xf32>
    %cst_14 = arith.constant dense<0.000000e+00> : vector<8x128xf32>
    %29 = vector.multi_reduction <add>, %28, %cst_14 [0] : vector<1x8x128xf32> to vector<8x128xf32>
    %30 = arith.addf %27, %29 : vector<8x128xf32>
    %c0_15 = arith.constant 0 : index
    %c0_16 = arith.constant 0 : index
    %31 = vector.load %arg5[%c0_15, %c0_16] : memref<8x128xf32, #tpu.memory_space<vmem>>, vector<8x128xf32>
    tpu.vector_store %arg5[%c0_15, %c0_16], %30 {strides = array<i32>} : memref<8x128xf32, #tpu.memory_space<vmem>>, vector<8x128xf32>,
    %c0_i32_17 = arith.constant 0 : i32
    %32 = arith.cmpi eq, %arg1, %c0_i32_17 : i32
    %33 = arith.extui %32 : i1 to i32
    %c0_i32_18 = arith.constant 0 : i32
    %34 = arith.cmpi ne, %33, %c0_i32_18 : i32
    scf.if %34 {
      %c0_19 = arith.constant 0 : index
      %c0_20 = arith.constant 0 : index
      %35 = vector.load %arg5[%c0_19, %c0_20] : memref<8x128xf32, #tpu.memory_space<vmem>>, vector<8x128xf32>
      %c0_21 = arith.constant 0 : index
      %c0_22 = arith.constant 0 : index
      %c0_23 = arith.constant 0 : index
      %36 = vector.load %arg4[%c0_21, %c0_22, %c0_23] : memref<1x8x128xf32, #tpu.memory_space<vmem>>, vector<1x8x128xf32>
      %37 = vector.shape_cast %36 : vector<1x8x128xf32> to vector<8x128xf32>
      %38 = vector.shape_cast %35 : vector<8x128xf32> to vector<1x8x128xf32>
      tpu.vector_store %arg4[%c0_21, %c0_22, %c0_23], %38 {strides = array<i32>} : memref<1x8x128xf32, #tpu.memory_space<vmem>>, vector<1x8x128xf32>,
    } else {
    }
    return
  }
  func.func @transform_0(%arg0: i32, %arg1: i32) -> (i32, i32) {
    %c1_i32 = arith.constant 1 : i32
    %0 = arith.muli %arg0, %c1_i32 : i32
    %1 = arith.addi %0, %arg1 : i32
    %c0_i32 = arith.constant 0 : i32
    %c0_i32_0 = arith.constant 0 : i32
    return %1, %c0_i32 : i32, i32
  }
  func.func @transform_1(%arg0: i32, %arg1: i32) -> (i32, i32) {
    %c1_i32 = arith.constant 1 : i32
    %0 = arith.muli %arg0, %c1_i32 : i32
    %1 = arith.addi %0, %arg1 : i32
    %c0_i32 = arith.constant 0 : i32
    %c0_i32_0 = arith.constant 0 : i32
    return %1, %c0_i32 : i32, i32
  }
  func.func @transform_2(%arg0: i32, %arg1: i32) -> (i32, i32, i32) {
    %c0_i32 = arith.constant 0 : i32
    %c0_i32_0 = arith.constant 0 : i32
    %c0_i32_1 = arith.constant 0 : i32
    return %arg0, %c0_i32, %c0_i32_0 : i32, i32, i32
  }
}

</mosaic_0001>

<bundles_post_ra>
// kernel: tpu_custom_call.1
= control target key start
LH: loop header
LB: loop body
LE: loop exit
PB: predicated region body
PF: predicated region fallthrough
CT: control target
= control target key end

     0   :  { %7 = vsyncpa [#allocation4], 0  ;;  %s922_s0 = inlined_call_operand.hbm [shape: f32[16,128], index: 0, kind: input, shape index: {}]   ;;  %s923_s1 = inlined_call_operand.hbm [shape: f32[16,128], index: 1, kind: input, shape index: {}]   ;;  %s924_s2 = inlined_call_operand.hbm [shape: f32[2,8,128], index: 2, kind: output, shape index: {}]  }
   0x1   :  { %9 = vsyncpa [#allocation4 + $0x1], 0 }
   0x2   :  { %10 = vsyncpa [#allocation7], 0 }
   0x3   :  { %12 = vsyncpa [#allocation7 + $0x1], 0 }
   0x4   :  { %13 = vsyncpa [#allocation5], 0 }
   0x5   :  { %15 = vsyncpa [#allocation5 + $0x1], 0  ;;  %s721_s9 = smov 0   ;;  %s723_s10 = smov 0  }
   0x6   :  { %s725_s11 = smov 0   ;;  %s727_s12 = smov 0  }
   0x7   :  { %s729_s13 = smov 0   ;;  %s731_s14 = smov 0  }
   0x8 LB: > { %s368_s15 = sadd.s32 4294967295, %s702_s14   ;;  %s369_s16 = sadd.s32 4294967294, %s702_s14   ;;  %s702_s14 = sphi %s731_s14, %s21_s14   ;;  %s698_s13 = sphi %s729_s13, %s935_s13   ;;  %s694_s12 = sphi %s727_s12, %s934_s12   ;;  %s690_s11 = sphi %s725_s11, %s933_s11   ;;  %s686_s10 = sphi %s723_s10, %s932_s10   ;;  %s682_s9 = sphi %s721_s9, %s931_s9  }
   0x9   : > { %s33_s17 = sadd.s32 1, %s698_s13  ;;  %s42_s18 = sadd.s32 1, %s690_s11 }
   0xa   : > { %p35_p0 = scmp.ge.s32.totalorder %s33_s17, 2  ;;  %p49_p1 = scmp.ne.s32.totalorder %s690_s11, %s686_s10 }
   0xb   : > { %p50_p2 = scmp.eq.s32.totalorder %s702_s14, 0  ;;  %p55_p3 = scmp.ne.s32.totalorder %s686_s10, %s682_s9 }
   0xc   : > { %s937_s17 = smov (%p35_p0, %s33_s17), 0  ;;  %p56_p5 = scmp.eq.s32.totalorder %s368_s15, 0 }
   0xd   : > { %p762_p4 = por %p50_p2, %p49_p1  ;;  %s39_s20 = ssub.s32 %s698_s13, %s937_s17 }
   0xe   : > { %p107_p6 = scmp.eq.s32.totalorder %s368_s15, 1  ;;  %p40_p7 = scmp.eq.s32.totalorder %s39_s20, 0 }
   0xf   : > { %p768_p8 = por %p56_p5, %p55_p3  ;;  %p113_p10 = scmp.eq.s32.totalorder %s369_s16, 1 }
  0x10   : > { %p772_p9 = por %p107_p6, %p49_p1  ;;  %p371_p12 = scmp.ge.s32.totalorder %s702_s14, 2 }
  0x11   : > { %s777_s23 = scalar_select %p40_p7, %s690_s11, %s42_s18  }
  0x12   : > { %p779_p11 = por %p113_p10, %p55_p3  ;;  %p500_p13 = scmp.lt.s32.totalorder %s702_s14, 2 }
  0x13   : > { %s133_s25 = sand.u32 1, %s690_s11   ;;  %s373_s27 = sshll.u32 %s698_s13, 3 }
  0x14   : > { %s372_s26 = sshll.u32 %s133_s25, 3  ;;  %s142_s30 = scalar_lea.hbm %s922_s0, %s373_s27 }
  0x15   : > { %s137_s3 = scalar_lea.vmem [#allocation3], %s372_s26  ;;  %s144_s5 = sshll.u32 %s142_s30, 4  ;;  %s145_s5 = int_to_ptr.hbm [resolvable:$true] %s144_s5 }
  0x16   : > { %s146_s4 = sshll.u32 %s137_s3, 4  ;;  %p490_p0 = pnand %p500_p13, %p762_p4  ;;  %s147_s4 = int_to_ptr.vmem [resolvable:$true] %s146_s4 }
  0x17   : > { %p376_p1 = scmp.ge.s32.totalorder %s702_s14, 1  ;;  %p171_p2 = scmp.lt.s32.totalorder %s702_s14, 3 }
  0x18   : > { %s134_s6 = scalar_lea.sflag [#allocation4], %s133_s25  ;;  %s162_s15 = scalar_lea.hbm %s923_s1, %s373_s27 }
  0x19   : > { %492 = dma.hbm_to_vmem [thread:$0]  (!%p490_p0), %s145_s5, 128, %s147_s4, %s134_s6  }
  0x1a   : > { %p172_p3 = pnand %p376_p1, %p171_p2  ;;  %s157_s16 = scalar_lea.vmem [#allocation6], %s372_s26 }
  0x1b   : > { %s166_s18 = sshll.u32 %s157_s16, 4  ;;  %s164_s20 = sshll.u32 %s162_s15, 4  ;;  %s167_s18 = int_to_ptr.vmem [resolvable:$true] %s166_s18  ;;  %s165_s20 = int_to_ptr.hbm [resolvable:$true] %s164_s20 }
  0x1c   : > { %s154_s28 = scalar_lea.sflag [#allocation7], %s133_s25  ;;  %175 = sbr.rel (%p172_p3) target bundleno = 102 (0x66), region = 28 }
  0x1d   : > { %495 = dma.hbm_to_vmem [thread:$0]  (!%p490_p0), %s165_s20, 128, %s167_s18, %s154_s28  }
  0x1e   : > { %s798_s19 = sand.u32 (!%p172_p3), 1, %s686_s10  }
  0x1f   : > { %s801_s29 = sshll.u32 (!%p172_p3), %s798_s19, 3  ;;  %s178_s30 = scalar_lea.sflag (!%p172_p3), [#allocation4], %s798_s19 }
  0x20   : > { %s181_s3 = scalar_lea.vmem (!%p172_p3), [#allocation3], %s801_s29 }
  0x21   : > { %669 = dma.done.wait (%p768_p8), %s178_s30, 128  }
  0x22   : > { %671 = vsyncadd (%p768_p8), %s178_s30, 4294967168  ;;  %s188_s25 = scalar_lea.sflag [#allocation7], %s798_s19  ;;  %s191_s26 = scalar_lea.vmem [#allocation6], %s801_s29 }
  0x23   : > { %673 = dma.done.wait (%p768_p8), %s188_s25, 128  }
  0x24   : > { %675 = vsyncadd (%p768_p8), %s188_s25, 4294967168  ;;  %v225_v0 = vld [vmem:[%s181_s3] sm:$0xff]  ;;  %v226_v1 = vld [vmem:[%s191_s26] sm:$0xff]  ;;  %v704_v56 = vmov 2139095040   ;;  %v705_v60 = vmov 0   ;;  %s382_s21 = sshll.u32 %s694_s12, 3 }
  0x25   : > { %v227_v2 = vsub.f32 %v225_v0, %v226_v1  ;;  %s260_s4 = scalar_lea.hbm %s924_s2, %s382_s21  ;;  %s217_s5 = scalar_lea.vmem [#allocation8], %s801_s29 }
  0x26   : > { %s262_s6 = sshll.u32 %s217_s5, 4  ;;  %s264_s7 = sshll.u32 %s260_s4, 4  ;;  %s263_s6 = int_to_ptr.vmem [resolvable:$true] %s262_s6  ;;  %s265_s7 = int_to_ptr.hbm [resolvable:$true] %s264_s7 }
  0x27   : > { %v815_v3 = vand.u32 2147483647, %v227_v2  ;;  %s250_s8 = scalar_lea.sflag [#allocation5], %s798_s19  ;;  %s630_s15 = sshra.s32 %s265_s7, 4  ;;  %s631_s15 = int_to_ptr.hbm [resolvable:$true] %s630_s15 }
  0x28   : > { %s632_s16 = scalar_lea.hbm %s631_s15, 8  ;;  %s636_s28 = scalar_lea.hbm %s924_s2, 16 }
  0x29   : > { %v380_v4 = vadd.f32 -1.0, %v815_v3  ;;  %v391_v5 = vand.u32 8388607, %v815_v3  ;;  %v387_v15 = vand.u32 2139095040, %v815_v3  ;;  %vm425_vm4 = vweird.f32 %v815_v3  ;;  %p633_p4 = scmp.ne.s32.totalorder %s631_s15, %s632_s16  ;;  %p637_p7 = scmp.lt.s32.totalorder %s631_s15, %s924_s2 }
  0x2a   : > { %vm424_vm5 = vcmp.lt.f32.partialorder %v815_v3, 0.0  ;;  %vm423_vm7 = vcmp.eq.f32.partialorder %v815_v3, 0.0  ;;  %vm453_vm9 = vcmp.eq.f32.partialorder %v815_v3, 0  ;;  %vm422_vm10 = vcmp.eq.f32.partialorder %v815_v3, 1.0  ;;  %p638_p8 = scmp.lt.s32.totalorder %s636_s28, %s632_s16 }
  0x2b   : > { %v230_v6 = vmul.f32 0.25, %v380_v4  ;;  %v392_v7 = vor.u32 8388608, %v391_v5  ;;  %v388_v21 = vshrl.u32 %v387_v15, 23  ;;  %vm455_vm11 = vcmp.gt.f32.partialorder %v815_v3, 1065353216  ;;  %p634_p5 = pnand %p633_p4, %p772_p9 }
  0x2c   : > { %p639_p10 = por %p638_p8, %p637_p7 }
  0x2d   : > { %552 = vtanh.f32 %v230_v6  ;;  %v394_v8 = vand.u32 8388607, %v392_v7  ;;  %v481_v28 = vadd.s32 4294967169, %v388_v21  ;;  %p635_p6 = pneg %p634_p5 }
  0x2f   : > { %v395_v9 = vor.u32 1065353216, %v394_v8  ;;  %v399_v34 = vadd.s32 1, %v481_v28  ;;  %p640_p13 = pnand %p639_p10, %p635_p6 }
  0x31   : > { %vm396_vm0 = vcmp.ge.f32.partialorder %v395_v9, 1.4142135  ;;  %v397_v10 = vmul.f32 0.5, %v395_v9 }
  0x32   : > { %v400_v42 = vsel %vm396_vm0, %v399_v34, %v481_v28 }
  0x33   : > { %v553_v11 = vpop.eup %552  ;;  %v398_v12 = vsel %vm396_vm0, %v397_v10, %v395_v9  ;;  %v420_v47 = vcvt.s32.f32 %v400_v42 }
  0x34   : > { %v232_v13 = vadd.f32 1.0, %v553_v11  ;;  %v482_v14 = vadd.f32 -1.0, %v398_v12 }
  0x36   : > { %v233_v16 = vmul.f32 0.5, %v232_v13  ;;  %v402_v17 = vmul.f32 %v482_v14, %v482_v14 }
  0x38   : > { %v234_v18 = vmul.f32 1.5, %v233_v16  ;;  %v403_v19 = vmul.f32 0.12621109, %v402_v17  ;;  %v405_v20 = vmul.f32 -0.20706727, %v402_v17 }
  0x3a   : > { %v235_v22 = vadd.f32 0.5, %v234_v18  ;;  %v404_v23 = vadd.f32 0.21545328, %v403_v19  ;;  %v406_v24 = vadd.f32 -0.23896284, %v405_v20 }
  0x3c   : > { %v821_v25 = vadd.f32 1.0, %v235_v22  ;;  %v407_v26 = vmul.f32 %v404_v23, %v402_v17  ;;  %v409_v27 = vmul.f32 %v406_v24, %v402_v17 }
  0x3e   : > { %v408_v29 = vadd.f32 0.28795174, %v407_v26  ;;  %v410_v30 = vadd.f32 -0.3607037, %v409_v27  ;;  %v824_v31 = vand.u32 2147483647, %v821_v25  ;;  %v438_v37 = vceil.f32 %v821_v25 }
  0x3f   : > { %v439_v38 = vfloor.f32 %v821_v25  ;;  %vm437_vm1 = vcmp.lt.s32.totalorder %v821_v25, 0  ;;  %vm436_vm8 = vcmp.lt.f32.partialorder %v821_v25, 0 }
  0x40   : > { %v411_v32 = vmul.f32 %v408_v29, %v402_v17  ;;  %v413_v33 = vmul.f32 %v410_v30, %v402_v17  ;;  %v445_v39 = vfloor.f32 %v824_v31  ;;  %vm433_vm2 = vcmp.eq.f32.partialorder %v824_v31, 2139095040  ;;  %vm462_vm14 = vmand %vm436_vm8, %vm453_vm9 }
  0x41   : > { %v440_v44 = vsel %vm437_vm1, %v438_v37, %v439_v38  ;;  %vm463_vm15 = vmxor %vm436_vm8, %vm455_vm11  ;;  %v469_v57 = vsel %vm436_vm8, 0, %v704_v56  ;;  %vm443_vm0 = vcmp.lt.f32.partialorder %v824_v31, 1266679808  ;;  %v459_v63 = vsel %vm436_vm8, 2139095040, %v705_v60 }
  0x42   : > { %v412_v35 = vadd.f32 0.48090908, %v411_v32  ;;  %v414_v36 = vadd.f32 -0.72134733, %v413_v33  ;;  %v446_v45 = vcvt.f32.s32 %v445_v39  ;;  %vm441_vm3 = vcmp.ne.f32.partialorder %v821_v25, %v440_v44 }
  0x43   : > { %vm837_vm6 = vmor %vm441_vm3, %vm433_vm2  ;;  %v470_v59 = vxor.u32 2147483648, %v469_v57  ;;  %vm474_vm11 = vcmp.ne.f32.partialorder %v815_v3, %v815_v3 }
  0x44   : > { %v415_v40 = vmul.f32 %v412_v35, %v402_v17  ;;  %v417_v41 = vmul.f32 %v482_v14, %v414_v36  ;;  %v447_v49 = vand.u32 1, %v446_v45  ;;  %vm449_vm13 = vmneg %vm837_vm6 }
  0x45   : > { %vm464_vm3 = vmor %vm462_vm14, %vm463_vm15  ;;  %vm454_vm14 = vcmp.eq.f32.partialorder %v815_v3, 1065353216 }
  0x46   : > { %v416_v43 = vadd.f32 1.442695, %v415_v40  ;;  %vm448_vm12 = vcmp.eq.s32.totalorder %v447_v49, 1  ;;  %v465_v61 = vsel %vm464_vm3, 2139095040, %v705_v60 }
  0x47   : > { %vm450_vm1 = vmand %vm448_vm12, %vm449_vm13  ;;  %vm475_vm12 = vcmp.ne.f32.partialorder %v821_v25, %v821_v25  ;;  %vm434_vm13 = vcmp.eq.f32.partialorder %v821_v25, 0 }
  0x48   : > { %v418_v46 = vadd.f32 %v417_v41, %v416_v43  ;;  %vm476_vm8 = vmor %vm474_vm11, %vm475_vm12 }
  0x49   : > { %vm478_vm15 = vmor %vm454_vm14, %vm434_vm13 }
  0x4a   : > { %v419_v48 = vmul.f32 %v482_v14, %v418_v46 }
  0x4c   : > { %v421_v50 = vadd.f32 %v420_v47, %v419_v48 }
  0x4e   : > { %v426_v52 = vsel %vm425_vm4, %v815_v3, %v421_v50  ;;  %vm451_vm4 = vmand %vm443_vm0, %vm450_vm1  ;;  %vm435_vm0 = vcmp.eq.f32.partialorder %v821_v25, 1065353216  ;;  %vm236_vm1 = vcmp.gt.f32.partialorder %v815_v3, 0.0 }
  0x4f   : > { %v427_v53 = vsel %vm424_vm5, nan, %v426_v52  ;;  %vm452_vm5 = vcmp.lt.f32.partialorder %v815_v3, 0  ;;  %v471_v62 = vsel %vm451_vm4, %v470_v59, %v469_v57 }
  0x50   : > { %v428_v54 = vsel %vm423_vm7, -inf, %v427_v53  ;;  %vm466_vm7 = vcmp.eq.f32.partialorder %v815_v3, 3212836864  ;;  %v472_v4 = vsel %vm452_vm5, %v471_v62, %v469_v57 }
  0x51   : > { %v429_v55 = vsel %vm422_vm10, 0.0, %v428_v54  ;;  %vm457_vm10 = vmand %vm452_vm5, %vm837_vm6  ;;  %v467_v1 = vsel %vm466_vm7, 1065353216, %v465_v61  ;;  %vm456_vm6 = vcmp.eq.f32.partialorder %v815_v3, 2139095040 }
  0x52   : > { %v430_v58 = vmul.f32 %v429_v55, %v821_v25 }
  0x54   : > { %554 = vpow2.f32 %v430_v58 }
  0x5a   : > { %v555_v0 = vpop.eup %554 }
  0x5b   : > { %v458_v2 = vsel %vm457_vm10, 2143289344, %v555_v0 }
  0x5c   : > { %v460_v5 = vsel %vm453_vm9, %v459_v63, %v458_v2 }
  0x5d   : > { %v468_v6 = vsel %vm433_vm2, %v467_v1, %v460_v5 }
  0x5e   : > { %v473_v7 = vsel %vm456_vm6, %v472_v4, %v468_v6 }
  0x5f   : > { %v477_v8 = vsel %vm476_vm8, 2143289344, %v473_v7 }
  0x60   : > { %v479_v9 = vsel %vm478_vm15, 1065353216, %v477_v8 }
  0x61   : > { %v480_v10 = vsel %vm435_vm0, %v815_v3, %v479_v9 }
  0x62   : > { %v239_v11 = vsel %vm236_vm1, %v480_v10, 0.0 }
  0x63   : > { %248 = vst [vmem:[%s217_s5] sm:$0xff] %v239_v11 }
  0x64   : > { %643 = shalt.err (!%p640_p13)
}
  0x65   : > { %487 = dma.vmem_to_hbm [thread:$0]  (%p772_p9), %s263_s6, 128, %s265_s7, %s250_s8  }
  0x66 PF: > { %s276_s19 = sand.u32 1, %s682_s9   ;;  %p497_p0 = pnand %p371_p12, %p779_p11 }
  0x67   : > { %s277_s3 = scalar_lea.sflag [#allocation5], %s276_s19 }
  0x68   : > { %p498_p1 = pneg %p497_p0 }
  0x6a   : > { %677 = dma.done.wait (%p498_p1), %s277_s3, 128  }
  0x6b   : > { %679 = vsyncadd (%p498_p1), %s277_s3, 4294967168  ;;  %s21_s14 = sadd.s32 1, %s702_s14   ;;  %s931_s9 = smov %s686_s10 }
  0x6c   : > { %p18_p2 = scmp.ge.s32.totalorder %s21_s14, 4   ;;  %s932_s10 = smov %s690_s11 }
  0x6d   : > { %s933_s11 = smov %s777_s23  ;;  %s934_s12 = smov %s698_s13 }
  0x6e   : > { %s935_s13 = smov %s937_s17  ;;  %20 = sbr.rel (!%p18_p2) target bundleno = 8 (0x8), region = 94 }
  0x73   :  { %283 = vsyncpa [#allocation4], 1 }
  0x74   :  { %285 = vsyncpa [#allocation4 + $0x1], 1 }
  0x75   :  { %286 = vsyncpa [#allocation7], 1 }
  0x76   :  { %288 = vsyncpa [#allocation7 + $0x1], 1 }
  0x77   :  { %289 = vsyncpa [#allocation5], 1 }
  0x78   :  { %291 = vsyncpa [#allocation5 + $0x1], 1 }

</bundles_post_ra>
